<compile_context>
chip_gen: v7x
topology: tpu7x:2x2x1
jax: 0.10.0
libtpu: 0.0.40
codegen_flags: <defaults>
</compile_context>

<pallas_src>
import jax
import jax.numpy as jnp
from jax.experimental import pallas as pl
from jax.experimental.pallas import tpu as pltpu


def _se_kernel(x_ref, w1t_ref, w2t_ref, o_ref):
    # x_ref : (TB, C, HW_pad)   activations (input dtype, possibly bf16)
    # w1t_ref: (C, C_red)       = (W1 / HW).T   (f32, 1/HW of the mean folded in)
    # w2t_ref: (C_red, C)       = W2.T          (f32)
    # o_ref : (TB, C, HW_pad)
    x = x_ref[...]                                                  # (TB, C, HW_pad)

    # Squeeze: spatial sum, accumulated in f32 (mean's 1/HW lives in w1t).
    y = jnp.sum(x, axis=-1, dtype=jnp.float32)                      # (TB, C)

    # Excitation MLP in lane-dense row form.
    h = jnp.dot(y, w1t_ref[...], preferred_element_type=jnp.float32)    # (TB, C_red)
    h = jnp.maximum(h, 0.0)
    s = jnp.dot(h, w2t_ref[...], preferred_element_type=jnp.float32)    # (TB, C)
    s = jax.nn.sigmoid(s)

    # Scale: broadcast the per-(batch,channel) gate over the spatial lanes.
    gate = s.astype(x.dtype)[:, :, None]                            # (TB, C, 1)
    out = x * gate
    if out.dtype != o_ref.dtype:                                    # static; usually a no-op
        out = out.astype(o_ref.dtype)
    o_ref[...] = out


def _choose_tb(B, C, HW_pad, itemsize, vmem_budget_bytes=8 * 1024 * 1024):
    """Largest divisor of B whose double-buffered (2 in + 2 out) working set fits
    the budget, while keeping >=2 grid steps when B >= 2 (v7x megacore)."""
    per_batch = 4 * C * HW_pad * itemsize
    max_tb = max(1, vmem_budget_bytes // per_batch)
    best = 1
    for tb in range(1, B + 1):
        if B % tb != 0 or tb > max_tb:
            continue
        if B >= 2 and (B // tb) < 2:
            continue
        best = tb
    return best


def se_block(x, w1, w2):
    """SEBlock forward.

    x : (B, C, H, W) activations (f32 or bf16)
    w1: (C//r, C) f32  -- first Linear weight (PyTorch (out, in) layout)
    w2: (C, C//r) f32  -- second Linear weight
    """
    B, C, H, W = x.shape
    HW = H * W
    C_red = w1.shape[0]

    # Lane-dense spatial-last layout; pad HW up to a multiple of 128 so stores
    # are full-width (masked vst.msk on a narrow lane axis throttles writeback).
    HW_pad = ((HW + 127) // 128) * 128
    x_flat = x.reshape(B, C, HW)
    if HW_pad != HW:
        x_flat = jnp.pad(x_flat, ((0, 0), (0, 0), (0, HW_pad - HW)))

    # Pre-transpose weights (row-form MLP) and fold the 1/HW of the mean into W1.
    w1t = (w1 * (1.0 / HW)).astype(jnp.float32).T                   # (C, C_red)
    w2t = w2.astype(jnp.float32).T                                  # (C_red, C)

    itemsize = jnp.dtype(x.dtype).itemsize
    TB = _choose_tb(B, C, HW_pad, itemsize)
    grid = (B // TB,)

    cost = pl.CostEstimate(
        flops=2 * B * C * HW + 4 * B * C * C_red,
        transcendentals=B * C,
        bytes_accessed=2 * B * C * HW_pad * itemsize + 2 * C * C_red * 4,
    )

    out_flat = pl.pallas_call(
        _se_kernel,
        out_shape=jax.ShapeDtypeStruct((B, C, HW_pad), x.dtype),
        grid_spec=pltpu.PrefetchScalarGridSpec(
            num_scalar_prefetch=0,
            grid=grid,
            in_specs=[
                pl.BlockSpec((TB, C, HW_pad), lambda b: (b, 0, 0)),
                pl.BlockSpec((C, C_red), lambda b: (0, 0)),
                pl.BlockSpec((C_red, C), lambda b: (0, 0)),
            ],
            out_specs=pl.BlockSpec((TB, C, HW_pad), lambda b: (b, 0, 0)),
        ),
        compiler_params=pltpu.CompilerParams(
            dimension_semantics=("parallel",),
            vmem_limit_bytes=32 * 1024 * 1024,
        ),
        cost_estimate=cost,
    )(x_flat, w1t, w2t)

    if HW_pad != HW:
        out_flat = out_flat[:, :, :HW]
    return out_flat.reshape(B, C, H, W)


def _reference(x, w1, w2):
    # Pure-JAX reference for sanity checking.
    xf = x.astype(jnp.float32)
    y = jnp.mean(xf, axis=(2, 3))                      # (B, C)
    h = jnp.maximum(y @ w1.T, 0.0)                     # (B, C//r)
    s = jax.nn.sigmoid(h @ w2.T)                       # (B, C)
    return (xf * s[:, :, None, None]).astype(x.dtype)


if __name__ == "__main__":
    # Small but SE-compatible shapes: channels must be divisible by reduction.
    B, C, H, W = 2, 64, 16, 16
    reduction = 16
    C_red = C // reduction

    key = jax.random.PRNGKey(0)
    kx, k1, k2 = jax.random.split(key, 3)
    x = jax.random.normal(kx, (B, C, H, W), dtype=jnp.float32)
    # Deterministic synthetic weights (PyTorch Linear weight shapes: (out, in)).
    w1 = jax.random.normal(k1, (C_red, C), dtype=jnp.float32) * 0.1
    w2 = jax.random.normal(k2, (C, C_red), dtype=jnp.float32) * 0.1

    out = se_block(x, w1, w2)
    out = jax.block_until_ready(out)

    ref = _reference(x, w1, w2)
    assert out.shape == (B, C, H, W)
    assert jnp.allclose(out, ref, atol=1e-5, rtol=1e-5), "mismatch vs reference"

    print("KERNEL_OK")
</pallas_src>

<mosaic_0001>
module attributes {stable_mosaic.version = 11 : i64} {
  func.func @_se_kernel(%arg0: i32, %arg1: memref<1x64x256xf32, #tpu.memory_space<vmem>>, %arg2: memref<64x4xf32, #tpu.memory_space<vmem>>, %arg3: memref<4x64xf32, #tpu.memory_space<vmem>>, %arg4: memref<1x64x256xf32, #tpu.memory_space<vmem>>) attributes {dimension_semantics = [#tpu.dimension_semantics<parallel>], iteration_bounds = array<i64: 2>, scalar_prefetch = 0 : i64, scratch_operands = 0 : i64, tpu.core_type = #tpu.core_type<tc>, window_params = [{transform_indices = @transform_0, window_bounds = array<i64: 1, 64, 256>}, {pipeline_mode = #tpu.pipeline_mode<synchronous>, transform_indices = @transform_1, window_bounds = array<i64: 64, 4>}, {pipeline_mode = #tpu.pipeline_mode<synchronous>, transform_indices = @transform_2, window_bounds = array<i64: 4, 64>}, {transform_indices = @transform_3, window_bounds = array<i64: 1, 64, 256>}]} {
    %c0 = arith.constant 0 : index
    %c0_0 = arith.constant 0 : index
    %c0_1 = arith.constant 0 : index
    %0 = vector.load %arg1[%c0, %c0_0, %c0_1] : memref<1x64x256xf32, #tpu.memory_space<vmem>>, vector<1x64x256xf32>
    %cst = arith.constant dense<0.000000e+00> : vector<1x64xf32>
    %1 = vector.multi_reduction <add>, %0, %cst [2] : vector<1x64x256xf32> to vector<1x64xf32>
    %c0_2 = arith.constant 0 : index
    %c0_3 = arith.constant 0 : index
    %2 = vector.load %arg2[%c0_2, %c0_3] : memref<64x4xf32, #tpu.memory_space<vmem>>, vector<64x4xf32>
    %cst_4 = arith.constant dense<0.000000e+00> : vector<1x4xf32>
    %3 = tpu.matmul %1, %2, %cst_4 {dimension_numbers = #tpu.dot_dimension_numbers<[1], [0], [0], [1], [0, 0, 1, 1], [], []>} : vector<1x64xf32>, vector<64x4xf32>, vector<1x4xf32> -> vector<1x4xf32>
    %cst_5 = arith.constant 0.000000e+00 : f32
    %4 = vector.broadcast %cst_5 : f32 to vector<1x4xf32>
    %5 = arith.maximumf %3, %4 : vector<1x4xf32>
    %c0_6 = arith.constant 0 : index
    %c0_7 = arith.constant 0 : index
    %6 = vector.load %arg3[%c0_6, %c0_7] : memref<4x64xf32, #tpu.memory_space<vmem>>, vector<4x64xf32>
    %cst_8 = arith.constant dense<0.000000e+00> : vector<1x64xf32>
    %7 = tpu.matmul %5, %6, %cst_8 {dimension_numbers = #tpu.dot_dimension_numbers<[1], [0], [0], [1], [0, 0, 1, 1], [], []>} : vector<1x4xf32>, vector<4x64xf32>, vector<1x64xf32> -> vector<1x64xf32>
    %8 = arith.negf %7 : vector<1x64xf32>
    %9 = math.exp %8 : vector<1x64xf32>
    %cst_9 = arith.constant 1.000000e+00 : f32
    %10 = vector.broadcast %cst_9 : f32 to vector<1x64xf32>
    %11 = arith.addf %10, %9 : vector<1x64xf32>
    %12 = arith.divf %10, %11 : vector<1x64xf32>
    %13 = vector.shape_cast %12 : vector<1x64xf32> to vector<1x64x1xf32>
    %14 = vector.broadcast %13 : vector<1x64x1xf32> to vector<1x64x256xf32>
    %15 = arith.mulf %0, %14 : vector<1x64x256xf32>
    %c0_10 = arith.constant 0 : index
    %c0_11 = arith.constant 0 : index
    %c0_12 = arith.constant 0 : index
    %16 = vector.load %arg4[%c0_10, %c0_11, %c0_12] : memref<1x64x256xf32, #tpu.memory_space<vmem>>, vector<1x64x256xf32>
    tpu.vector_store %arg4[%c0_10, %c0_11, %c0_12], %15 {strides = array<i32>} : memref<1x64x256xf32, #tpu.memory_space<vmem>>, vector<1x64x256xf32>,
    return
  }
  func.func @transform_0(%arg0: i32) -> (i32, i32, i32) {
    %c0_i32 = arith.constant 0 : i32
    %c0_i32_0 = arith.constant 0 : i32
    %c0_i32_1 = arith.constant 0 : i32
    return %arg0, %c0_i32, %c0_i32_0 : i32, i32, i32
  }
  func.func @transform_1(%arg0: i32) -> (i32, i32) {
    %c0_i32 = arith.constant 0 : i32
    %c0_i32_0 = arith.constant 0 : i32
    %c0_i32_1 = arith.constant 0 : i32
    return %c0_i32, %c0_i32_0 : i32, i32
  }
  func.func @transform_2(%arg0: i32) -> (i32, i32) {
    %c0_i32 = arith.constant 0 : i32
    %c0_i32_0 = arith.constant 0 : i32
    %c0_i32_1 = arith.constant 0 : i32
    return %c0_i32, %c0_i32_0 : i32, i32
  }
  func.func @transform_3(%arg0: i32) -> (i32, i32, i32) {
    %c0_i32 = arith.constant 0 : i32
    %c0_i32_0 = arith.constant 0 : i32
    %c0_i32_1 = arith.constant 0 : i32
    return %arg0, %c0_i32, %c0_i32_0 : i32, i32, i32
  }
}

</mosaic_0001>

<bundles_post_ra>
// kernel: tpu_custom_call.1
= control target key start
LH: loop header
LB: loop body
LE: loop exit
PB: predicated region body
PF: predicated region fallthrough
CT: control target
= control target key end

     0   :  { %8 = vsyncpa [#allocation3], 0  ;;  %s1151_s0 = inlined_call_operand.hbm [shape: f32[2,64,256], index: 0, kind: input, shape index: {}]   ;;  %s1152_s1 = inlined_call_operand.vmem [shape: f32[64,4], index: 1, kind: input, shape index: {}]   ;;  %s1153_s2 = inlined_call_operand.vmem [shape: f32[4,64], index: 2, kind: input, shape index: {}]   ;;  %s1154_s3 = inlined_call_operand.hbm [shape: f32[2,64,256], index: 3, kind: output, shape index: {}]  }
   0x1   :  { %10 = vsyncpa [#allocation3 + $0x1], 0 }
   0x2   :  { %11 = vsyncpa [#allocation4], 0 }
   0x3   :  { %13 = vsyncpa [#allocation4 + $0x1], 0  ;;  %s864_s12 = smov 0   ;;  %s866_s13 = smov 0  }
   0x4   :  { %s868_s14 = smov 0   ;;  %s870_s15 = smov 0  }
   0x5 LB: > { %s885_s16 = sadd.s32 4294967295, %s833_s15   ;;  %s613_s17 = sadd.s32 4294967294, %s833_s15   ;;  %s833_s15 = sphi %s870_s15, %s1167_s15   ;;  %s829_s14 = sphi %s868_s14, %s1166_s14   ;;  %s825_s13 = sphi %s866_s13, %s1165_s13   ;;  %s821_s12 = sphi %s864_s12, %s1164_s12  }
   0x6   : > { %s889_s18 = sadd.s32 1, %s833_s15   ;;  %s26_s19 = sadd.s32 1, %s829_s14 }
   0x7   : > { %s23_s20 = ssub.s32 %s833_s15, %s889_s18  ;;  %p33_p0 = scmp.ne.s32.totalorder %s829_s14, %s825_s13 }
   0x8   : > { %p24_p1 = scmp.eq.s32.totalorder %s23_s20, 0  ;;  %p34_p2 = scmp.eq.s32.totalorder %s833_s15, 0 }
   0x9   : > { %p39_p3 = scmp.ne.s32.totalorder %s825_s13, %s821_s12  ;;  %p40_p4 = scmp.eq.s32.totalorder %s885_s16, 0 }
   0xa   : > { %s901_s21 = scalar_select %p24_p1, %s829_s14, %s26_s19  }
   0xb   : > { %p903_p5 = por %p34_p2, %p33_p0  ;;  %p907_p6 = por %p40_p4, %p39_p3 }
   0xc   : > { %p105_p7 = scmp.eq.s32.totalorder %s885_s16, 1  ;;  %p111_p8 = scmp.eq.s32.totalorder %s613_s17, 1 }
   0xd   : > { %p692_p10 = scmp.lt.s32.totalorder %s833_s15, 2  ;;  %s137_s26 = sand.u32 1, %s829_s14  }
   0xe   : > { %p914_p11 = por %p105_p7, %p33_p0  ;;  %p918_p12 = por %p111_p8, %p39_p3 }
   0xf   : > { %s631_s27 = sshll.u32 %s833_s15, 11  ;;  %s616_s28 = sshll.u32 %s137_s26, 7 }
  0x10   : > { %s1158_s24 = scalar_select %p914_p11, 1, 0 }
  0x11   : > { %s1159_s25 = scalar_select %p918_p12, 1, 0 }
  0x12   : > { %s927_s4 = scalar_lea.hbm %s1151_s0, %s631_s27  ;;  %s141_s5 = scalar_lea.vmem [#allocation2], %s616_s28 }
  0x13   : > { %s148_s6 = sshll.u32 %s141_s5, 4  ;;  %p931_p13 = pnand %p692_p10, %p903_p5  ;;  %s935_s6 = int_to_ptr.vmem [resolvable:$true] %s148_s6 }
  0x14   : > { %s937_s8 = scalar_lea.sflag [#allocation3], %s137_s26  ;;  %s737_s9 = scalar_lea.hbm %s927_s4, 2048 }
  0x15   : > { %p738_p0 = scmp.ne.s32.totalorder %s927_s4, %s737_s9  ;;  %p739_p1 = pneg %p931_p13 }
  0x16   : > { %s742_s17 = scalar_lea.hbm %s1151_s0, 4096  ;;  %p743_p4 = scmp.lt.u32.totalorder %s927_s4, %s1151_s0 }
  0x17   : > { %p740_p2 = pnand %p739_p1, %p738_p0  ;;  %p744_p5 = scmp.lt.u32.totalorder %s742_s17, %s737_s9 }
  0x18   : > { %p746_p8 = scmp.lt.u32.totalorder %s737_s9, %s927_s4 }
  0x19   : > { %p741_p3 = pneg %p740_p2  ;;  %p745_p7 = por %p744_p5, %p743_p4 }
  0x1b   : > { %p747_p10 = por %p746_p8, %p745_p7 }
  0x1d   : > { %p748_p9 = pnand %p747_p10, %p741_p3 }
  0x1f   : > { %751 = shalt.err (!%p748_p9)
}
  0x20   : > { %s752_s22 = scalar_lea.vmem %s935_s6, 2048  ;;  %s835_s26 = smov [#allocation2]  }
  0x21   : > { %p753_p0 = scmp.ne.s32.totalorder %s935_s6, %s752_s22  ;;  %s757_s27 = sshll.u32 %s835_s26, 4  ;;  %s758_s27 = int_to_ptr.vmem [resolvable:$false] %s757_s27 }
  0x22   : > { %s759_s28 = scalar_lea.vmem %s758_s27, 4096  ;;  %p760_p11 = scmp.lt.s32.totalorder %s935_s6, %s758_s27 }
  0x23   : > { %p755_p2 = pnand %p753_p0, %p739_p1  ;;  %p761_p4 = scmp.lt.s32.totalorder %s759_s28, %s752_s22 }
  0x25   : > { %p756_p12 = pneg %p755_p2  ;;  %p762_p5 = por %p761_p4, %p760_p11 }
  0x27   : > { %p763_p7 = pnand %p762_p5, %p756_p12 }
  0x29   : > { %766 = shalt.err (!%p763_p7)
}
  0x2a   : > { %s836_s29 = smov 256   ;;  %s837_s30 = smov 16  }
  0x2b   : > { %687 = dma.hbm_to_vmem [thread:$0]  (!%p931_p13), %s927_s4, 2048, %s935_s6, %s937_s8, %s836_s29, %s836_s29, %s837_s30  }
  0x2c   : > { %p619_p9 = scmp.ge.s32.totalorder %s833_s15, 1  ;;  %p156_p1 = scmp.lt.s32.totalorder %s833_s15, 3 }
  0x2e   : > { %p157_p3 = pnand %p619_p9, %p156_p1 }
  0x2f   : > { %s968_s5 = sand.u32 (!%p157_p3), 1, %s825_s13  }
  0x30   : > { %160 = sbr.rel (%p157_p3) target bundleno = 819 (0x333), region = 32  ;;  %s620_s9 = sshll.u32 (!%p157_p3), %s968_s5, 7 }
  0x31   : > { %s163_s10 = scalar_lea.sflag (!%p157_p3), [#allocation3], %s968_s5  ;;  %s166_s11 = scalar_lea.vmem (!%p157_p3), [#allocation2], %s620_s9 }
  0x37   : > { %812 = dma.done.wait (%p907_p6), %s163_s10, 2048  }
  0x38   : > { %814 = vsyncadd (%p907_p6), %s163_s10, 4294965248  ;;  %v978_v0 = vld [vmem:[%s166_s11] sm:$0xff]  ;;  %v980_v1 = vld [vmem:[%s166_s11 + $0x8] sm:$0xff]  ;;  %v838_v27 = vmov 0.0|0.0   ;;  %vm839_vm0 = vmmov 0   ;;  %v840_v37 = vmov 0.0   ;;  %v245_v38 = vlaneseq }
  0x39   : > { %v982_v2 = vld [vmem:[%s166_s11 + $0x20] sm:$0xff]  ;;  %v205_v3 = vadd.f32 %v980_v1, %v978_v0  ;;  %v986_v4 = vld [vmem:[%s166_s11 + $0x28] sm:$0xff]  ;;  %v988_v5 = vld [vmem:[%s166_s11 + $0x10] sm:$0xff]  ;;  %668 = vmatprep.subr.bf16.mxu0 %v838_v27  ;;  %660 = vmatprep.mubr.msk.f32.mxu0 %vm839_vm0, %v840_v37  ;;  %vm256_vm1 = vcmask 130112   ;;  %vm263_vm2 = vcmask 195712   ;;  %vm270_vm3 = vcmask 261312  }
  0x3a   : > { %v990_v6 = vld [vmem:[%s166_s11 + $0x18] sm:$0xff]  ;;  %v211_v7 = vadd.f32 %v986_v4, %v982_v2  ;;  %v994_v8 = vld [vmem:[%s166_s11 + $0x30] sm:$0xff]  ;;  %v1002_v12 = vld [vmem:[%s166_s11 + $0x40] sm:$0xff]  ;;  %663 = vmatprep.subr.mxu1 %v840_v37  ;;  %665 = vmatprep.mubr.msk.f32.mxu1 %vm839_vm0, %v840_v37  ;;  %v246_v39 = vand.u32 127, %v245_v38  ;;  %v1050_v40 = vshrl.u32 %v245_v38, 7  ;;  %vm277_vm4 = vcmask 326912  }
  0x3b   : > { %v996_v9 = vld [vmem:[%s166_s11 + $0x38] sm:$0xff]  ;;  %206 = vadd.xlane.f32.xlu0 %v205_v3  ;;  %v208_v10 = vadd.f32 %v990_v6, %v988_v5  ;;  %v1004_v13 = vld [vmem:[%s166_s11 + $0x48] sm:$0xff]  ;;  %v1006_v14 = vld [vmem:[%s166_s11 + $0x50] sm:$0xff]  ;;  %vm284_vm5 = vcmask 392512   ;;  %vm291_vm6 = vcmask 458112   ;;  %vm298_vm7 = vcmask 523712  }
  0x3c   : > { %212 = vadd.xlane.f32.xlu1 %v211_v7  ;;  %v214_v11 = vadd.f32 %v996_v9, %v994_v8  ;;  %v1008_v15 = vld [vmem:[%s166_s11 + $0x58] sm:$0xff]  ;;  %v217_v16 = vadd.f32 %v1004_v13, %v1002_v12  ;;  %v1014_v18 = vld [vmem:[%s166_s11 + $0x60] sm:$0xff]  ;;  %v1016_v19 = vld [vmem:[%s166_s11 + $0x68] sm:$0xff]  ;;  %v251_v41 = vadd.s32 4294967288, %v246_v39  ;;  %v258_v42 = vadd.s32 4294967280, %v246_v39  ;;  %s1070_s6 = scalar_lea.vmem [#allocation5], %s620_s9 }
  0x3d   : > { %v220_v17 = vadd.f32 %v1008_v15, %v1006_v14  ;;  %v1018_v20 = vld [vmem:[%s166_s11 + $0x70] sm:$0xff]  ;;  %v1020_v21 = vld [vmem:[%s166_s11 + $0x78] sm:$0xff]  ;;  %v223_v22 = vadd.f32 %v1016_v19, %v1014_v18  ;;  %v229_v24 = vld [vmem:[%s1152_s1] sm:$0xff]  ;;  %v265_v43 = vadd.s32 4294967272, %v246_v39  ;;  %v249_v45 = vsub.s32 %v246_v39, %v1050_v40  ;;  %s632_s9 = sshll.u32 %s885_s16, 11  ;;  %s540_s7 = sshll.u32 %s1070_s6, 4  ;;  %s1103_s7 = int_to_ptr.vmem [resolvable:$true] %s540_s7 }
  0x3e   : > { %v226_v23 = vadd.f32 %v1020_v21, %v1018_v20  ;;  %v230_v25 = vld [vmem:[%s1152_s1 + $0x8] sm:$0xff]  ;;  %v231_v28 = vld [vmem:[%s1152_s1 + $0x10] sm:$0xff]  ;;  %v232_v29 = vld [vmem:[%s1152_s1 + $0x18] sm:$0xff]  ;;  %v254_v47 = vsub.s32 %v251_v41, %v1050_v40  ;;  %v272_v48 = vadd.s32 4294967264, %v246_v39  ;;  %v261_v49 = vsub.s32 %v258_v42, %v1050_v40  ;;  %s1101_s19 = scalar_lea.hbm %s1154_s3, %s632_s9  ;;  %s527_s16 = scalar_lea.sflag [#allocation4], %s968_s5 }
  0x3f   : > { %209 = vadd.xlane.f32.xlu0 %v208_v10  ;;  %v669_v26 = vpack.c.bf16 %v230_v25, %v229_v24  ;;  %v672_v30 = vpack.c.bf16 %v232_v29, %v231_v28  ;;  %v233_v31 = vld [vmem:[%s1152_s1 + $0x20] sm:$0xff]  ;;  %v234_v32 = vld [vmem:[%s1152_s1 + $0x28] sm:$0xff]  ;;  %v235_v34 = vld [vmem:[%s1152_s1 + $0x30] sm:$0xff]  ;;  %v268_v50 = vsub.s32 %v265_v43, %v1050_v40  ;;  %v279_v51 = vadd.s32 4294967256, %v246_v39  ;;  %s767_s20 = scalar_lea.vmem %s1103_s7, 2048  ;;  %p1161_p11 = scmp.ne.s32.totalorder %s1158_s24, 0 }
  0x40   : > { %215 = vadd.xlane.f32.xlu1 %v214_v11  ;;  %v675_v33 = vpack.c.bf16 %v234_v32, %v233_v31  ;;  %v236_v35 = vld [vmem:[%s1152_s1 + $0x38] sm:$0xff]  ;;  %v275_v56 = vsub.s32 %v272_v48, %v1050_v40  ;;  %v286_v57 = vadd.s32 4294967248, %v246_v39  ;;  %v293_v61 = vadd.s32 4294967240, %v246_v39  ;;  %v374_v31 = vld [vmem:[%s1153_s2] sm:$0xf]  ;;  %p768_p6 = scmp.ne.s32.totalorder %s1103_s7, %s767_s20  ;;  %s841_s22 = smov [#allocation5]  }
  0x41   : > { %670 = vmatpush3.bf16.msra.mxu0 %v669_v26  ;;  %v678_v36 = vpack.c.bf16 %v236_v35, %v235_v34  ;;  %v282_v60 = vsub.s32 %v279_v51, %v1050_v40  ;;  %vm300_vm8 = vcmask 523264   ;;  %vm379_vm9 = vcmask 1043456   ;;  %s771_s26 = sshll.u32 %s841_s22, 4  ;;  %s772_s26 = int_to_ptr.vmem [resolvable:$false] %s771_s26 }
  0x42   : > { %671 = vmatprep.subr.bf16.mxu0 %v838_v27  ;;  %664 = vmatpush3.msk.msra.mxu1 %vm379_vm9, %v374_v31  ;;  %vm375_vm10 = vcmask 31744   ;;  %v461_v41 = vsub.s32 0, %v1050_v40  ;;  %p769_p12 = pnand %p768_p6, %p1161_p11  ;;  %s773_s27 = scalar_lea.vmem %s772_s26, 4096 }
  0x43   : > { %218 = vadd.xlane.f32.xlu0 %v217_v16  ;;  %v289_v16 = vsub.s32 %v286_v57, %v1050_v40  ;;  %p774_p8 = scmp.lt.s32.totalorder %s1103_s7, %s772_s26  ;;  %p775_p10 = scmp.lt.s32.totalorder %s773_s27, %s767_s20 }
  0x44   : > { %221 = vadd.xlane.f32.xlu1 %v220_v17  ;;  %p770_p13 = pneg %p769_p12 }
  0x45   : > { %673 = vmatpush3.bf16.msra.mxu0 %v672_v30  ;;  %p776_p0 = por %p775_p10, %p774_p8 }
  0x46   : > { %674 = vmatprep.subr.bf16.mxu0 %v838_v27 }
  0x47   : > { %224 = vadd.xlane.f32.xlu0 %v223_v22  ;;  %v296_v22 = vsub.s32 %v293_v61, %v1050_v40  ;;  %p777_p2 = pnand %p776_p0, %p770_p13 }
  0x48   : > { %227 = vadd.xlane.f32.xlu1 %v226_v23 }
  0x49   : > { %676 = vmatpush3.bf16.msra.mxu0 %v675_v33 }
  0x4a   : > { %677 = vmatprep.subr.bf16.mxu0 %v838_v27 }
  0x4d   : > { %679 = vmatpush3.bf16.msra.mxu0 %v678_v36 }
  0xc8   : > { %v207_v44 = vpop.xlane.xlu0 %206 }
  0xc9   : > { %v213_v46 = vpop.xlane.xlu1 %212  ;;  %v250_v53 = vrot.slane %v207_v44, %v249_v45 }
  0xca   : > { %v262_v58 = vrot.slane %v213_v46, %v261_v49 }
  0xcc   : > { %v210_v52 = vpop.xlane.xlu0 %209 }
  0xcd   : > { %v255_v54 = vrot.slane %v210_v52, %v254_v47  ;;  %v216_v55 = vpop.xlane.xlu1 %215 }
  0xce   : > { %v269_v59 = vrot.slane %v216_v55, %v268_v50 }
  0xcf   : > { %v257_v62 = vsel %vm256_vm1, %v255_v54, %v250_v53 }
  0xd0   : > { %v264_v63 = vsel %vm263_vm2, %v262_v58, %v257_v62  ;;  %v219_v3 = vpop.xlane.xlu0 %218 }
  0xd1   : > { %v271_v7 = vsel %vm270_vm3, %v269_v59, %v264_v63  ;;  %v276_v10 = vrot.slane %v219_v3, %v275_v56  ;;  %v222_v11 = vpop.xlane.xlu1 %221 }
  0xd2   : > { %v283_v17 = vrot.slane %v222_v11, %v282_v60 }
  0xd3   : > { %v278_v23 = vsel %vm277_vm4, %v276_v10, %v271_v7 }
  0xd4   : > { %v225_v24 = vpop.xlane.xlu0 %224  ;;  %v285_v27 = vsel %vm284_vm5, %v283_v17, %v278_v23 }
  0xd5   : > { %v290_v25 = vrot.slane %v225_v24, %v289_v16  ;;  %v228_v26 = vpop.xlane.xlu1 %227 }
  0xd6   : > { %v297_v28 = vrot.slane %v228_v26, %v296_v22 }
  0xd7   : > { %v292_v29 = vsel %vm291_vm6, %v290_v25, %v285_v27 }
  0xd8   : > { %v299_v30 = vsel %vm298_vm7, %v297_v28, %v292_v29 }
  0xd9   : > { %661 = vmatmul.mubr.msk.f32.vlgmr.msra.gmra.mrb[0].mxu0 %vm300_vm8, %v299_v30 }
 0x1ac   : > { %v369_v32 = vpop.f32.mrb[0].mxu0 }
 0x1ad   : > { %v373_v33 = vmax.f32 %v369_v32, 0.0  ;;  %v662_v34 = vpop.f32.mrb[1].mxu0 }
 0x1af   : > { %666 = vmatmul.mubr.msk.f32.vlgmr.msra.gmra.mrb[0].mxu1 %vm375_vm10, %v373_v33 }
 0x282   : > { %v449_v35 = vpop.f32.mrb[0].mxu1 }
 0x283   : > { %v625_v36 = vmul.f32 -1.442695, %v449_v35  ;;  %v667_v37 = vpop.f32.mrb[1].mxu1 }
 0x285   : > { %733 = vpow2.f32 %v625_v36 }
 0x28f   : > { %v734_v38 = vpop.eup %733 }
 0x290   : > { %v456_v39 = vadd.f32 1.0, %v734_v38 }
 0x292   : > { %735 = vrcp.f32 %v456_v39 }
 0x29c   : > { %v736_v42 = vpop.eup %735 }
 0x29d   : > { %v462_v43 = vrot.slane %v736_v42, %v461_v41 }
 0x29f   : > { %468 = vbcast.lane.b32.xlu1 %v462_v43, 264  ;;  %464 = vbcast.lane.b32.xlu0 %v462_v43, 256 }
 0x2a3   : > { %472 = vbcast.lane.b32.xlu1 %v462_v43, 272  ;;  %480 = vbcast.lane.b32.xlu0 %v462_v43, 288 }
 0x2a7   : > { %476 = vbcast.lane.b32.xlu1 %v462_v43, 280  ;;  %488 = vbcast.lane.b32.xlu0 %v462_v43, 304 }
 0x2ab   : > { %484 = vbcast.lane.b32.xlu1 %v462_v43, 296 }
 0x2af   : > { %492 = vbcast.lane.b32.xlu1 %v462_v43, 312 }
 0x311   : > { %v469_v44 = vpop.permute.xlu1 %468  ;;  %v465_v45 = vpop.permute.xlu0 %464 }
 0x312   : > { %v496_v46 = vmul.f32 %v469_v44, %v988_v5  ;;  %v497_v47 = vmul.f32 %v469_v44, %v990_v6  ;;  %v494_v48 = vmul.f32 %v465_v45, %v978_v0  ;;  %v495_v40 = vmul.f32 %v465_v45, %v980_v1 }
 0x314   : > { %512 = vst [vmem:[%s1070_s6 + $0x10] sm:$0xff] %v496_v46  ;;  %513 = vst [vmem:[%s1070_s6 + $0x18] sm:$0xff] %v497_v47 }
 0x315   : > { %510 = vst [vmem:[%s1070_s6] sm:$0xff] %v494_v48  ;;  %511 = vst [vmem:[%s1070_s6 + $0x8] sm:$0xff] %v495_v40  ;;  %v473_v5 = vpop.permute.xlu1 %472  ;;  %v481_v0 = vpop.permute.xlu0 %480 }
 0x316   : > { %v498_v1 = vmul.f32 %v473_v5, %v982_v2  ;;  %v499_v6 = vmul.f32 %v473_v5, %v986_v4  ;;  %v502_v49 = vmul.f32 %v481_v0, %v1002_v12  ;;  %v503_v50 = vmul.f32 %v481_v0, %v1004_v13 }
 0x318   : > { %514 = vst [vmem:[%s1070_s6 + $0x20] sm:$0xff] %v498_v1  ;;  %515 = vst [vmem:[%s1070_s6 + $0x28] sm:$0xff] %v499_v6 }
 0x319   : > { %518 = vst [vmem:[%s1070_s6 + $0x40] sm:$0xff] %v502_v49  ;;  %519 = vst [vmem:[%s1070_s6 + $0x48] sm:$0xff] %v503_v50  ;;  %v477_v51 = vpop.permute.xlu1 %476  ;;  %v489_v52 = vpop.permute.xlu0 %488 }
 0x31a   : > { %v500_v2 = vmul.f32 %v477_v51, %v994_v8  ;;  %v501_v53 = vmul.f32 %v477_v51, %v996_v9  ;;  %v506_v4 = vmul.f32 %v489_v52, %v1014_v18  ;;  %v507_v12 = vmul.f32 %v489_v52, %v1016_v19 }
 0x31c   : > { %516 = vst [vmem:[%s1070_s6 + $0x30] sm:$0xff] %v500_v2  ;;  %517 = vst [vmem:[%s1070_s6 + $0x38] sm:$0xff] %v501_v53 }
 0x31d   : > { %522 = vst [vmem:[%s1070_s6 + $0x60] sm:$0xff] %v506_v4  ;;  %523 = vst [vmem:[%s1070_s6 + $0x68] sm:$0xff] %v507_v12  ;;  %v485_v13 = vpop.permute.xlu1 %484 }
 0x31e   : > { %v504_v54 = vmul.f32 %v485_v13, %v1006_v14  ;;  %v505_v55 = vmul.f32 %v485_v13, %v1008_v15 }
 0x320   : > { %520 = vst [vmem:[%s1070_s6 + $0x50] sm:$0xff] %v504_v54  ;;  %521 = vst [vmem:[%s1070_s6 + $0x58] sm:$0xff] %v505_v55 }
 0x321   : > { %v493_v8 = vpop.permute.xlu1 %492 }
 0x322   : > { %v508_v9 = vmul.f32 %v493_v8, %v1018_v20  ;;  %v509_v14 = vmul.f32 %v493_v8, %v1020_v21 }
 0x324   : > { %524 = vst [vmem:[%s1070_s6 + $0x70] sm:$0xff] %v508_v9  ;;  %525 = vst [vmem:[%s1070_s6 + $0x78] sm:$0xff] %v509_v14 }
 0x325   : > { %780 = shalt.err (!%p777_p2)
}
 0x326   : > { %s781_s28 = scalar_lea.hbm %s1101_s19, 2048  ;;  %s785_s10 = scalar_lea.hbm %s1154_s3, 4096 }
 0x327   : > { %p782_p4 = scmp.ne.s32.totalorder %s1101_s19, %s781_s28  ;;  %p786_p9 = scmp.lt.u32.totalorder %s1101_s19, %s1154_s3 }
 0x328   : > { %p787_p1 = scmp.lt.u32.totalorder %s785_s10, %s781_s28  ;;  %p789_p6 = scmp.lt.u32.totalorder %s781_s28, %s1101_s19 }
 0x329   : > { %p783_p5 = pnand %p782_p4, %p1161_p11 }
 0x32a   : > { %p788_p3 = por %p787_p1, %p786_p9 }
 0x32b   : > { %p784_p7 = pneg %p783_p5 }
 0x32c   : > { %p790_p12 = por %p789_p6, %p788_p3 }
 0x32e   : > { %p791_p13 = pnand %p790_p12, %p784_p7 }
 0x330   : > { %794 = shalt.err (!%p791_p13)
}
 0x331   : > { %s842_s4 = smov 256   ;;  %s843_s6 = smov 16  }
 0x332   : > { %682 = dma.vmem_to_hbm [thread:$0]  (%p1161_p11), %s1103_s7, 2048, %s1101_s19, %s527_s16, %s842_s4, %s842_s4, %s843_s6  }
 0x333 PF: > { %s555_s9 = sand.u32 1, %s821_s12   ;;  %p1162_p8 = scmp.ne.s32.totalorder %s1159_s25, 0 }
 0x334   : > { %p1163_p10 = scmp.ge.s32.totalorder %s833_s15, 2  ;;  %s556_s8 = scalar_lea.sflag [#allocation4], %s555_s9 }
 0x336   : > { %p689_p0 = pnand %p1163_p10, %p1162_p8 }
 0x338   : > { %816 = dma.done.wait (!%p689_p0), %s556_s8, 2048  }
 0x339   : > { %818 = vsyncadd (!%p689_p0), %s556_s8, 4294965248  ;;  %p16_p2 = scmp.ge.s32.totalorder %s889_s18, 4   ;;  %s1164_s12 = smov %s825_s13 }
 0x33a   : > { %s1165_s13 = smov %s829_s14  ;;  %s1166_s14 = smov %s901_s21 }
 0x33b   : > { %s1167_s15 = smov %s889_s18  ;;  %18 = sbr.rel (!%p16_p2) target bundleno = 5 (0x5), region = 77 }
 0x342   :  { %561 = vsyncpa [#allocation3], 1 }
 0x343   :  { %563 = vsyncpa [#allocation3 + $0x1], 1 }
 0x344   :  { %564 = vsyncpa [#allocation4], 1 }
 0x345   :  { %566 = vsyncpa [#allocation4 + $0x1], 1 }

</bundles_post_ra>
